<compile_context>
chip_gen: v5e
topology: v5e:2x2
jax: 0.10.0
libtpu: 0.0.40
codegen_flags: <defaults>
</compile_context>

<pallas_src>
import jax
import jax.numpy as jnp
from jax.experimental import pallas as pl
from jax.experimental.pallas import tpu as pltpu


def _round_up(n, m):
    return ((n + m - 1) // m) * m


def _projection_head_kernel(x_ref, w1_ref, b1_ref, w2_ref, b2_ref, o_ref):
    # x tile: (TM, Cin_p) bf16; weights bf16; biases f32; output f32 (lane-dense).
    x = x_ref[...]
    # Linear 1 (MXU, f32 accumulate) + bias + ReLU in f32 (VPU).
    h = jnp.dot(x, w1_ref[...], preferred_element_type=jnp.float32)
    h = jnp.maximum(h + b1_ref[...], 0.0)
    # Linear 2 (MXU, f32 accumulate; h quantized to bf16 for the MXU) + bias.
    y = jnp.dot(h.astype(w2_ref.dtype), w2_ref[...], preferred_element_type=jnp.float32)
    y = y + b2_ref[...]
    # F.normalize(y, p=2, dim=-1): padded output columns are exactly zero, so the
    # squared sum over the padded lane dim equals the true squared norm.
    sq = jnp.maximum(jnp.sum(y * y, axis=-1, keepdims=True), 1e-24)  # eps^2
    inv = jax.lax.rsqrt(sq)                                          # EUP rsqrt
    o_ref[...] = (y * inv).astype(o_ref.dtype)


def projection_head(x, w1, b1, w2, b2, *, tm_max=512):
    """x: (B, Cin); w1: (Cin, Cin); b1: (Cin,)/(1,Cin); w2: (Cin, Cout); b2: (Cout,)/(1,Cout)."""
    B, Cin = x.shape
    Cout = w2.shape[1]
    out_dtype = x.dtype
    b1 = b1.reshape(1, -1)
    b2 = b2.reshape(1, -1)

    # --- Lane-dense padding (exact math: padded rows/cols are zeros). ---
    Cin_p = _round_up(Cin, 128)
    Cout_p = _round_up(Cout, 128)
    if Cin_p != Cin:
        dc = Cin_p - Cin
        x = jnp.pad(x, ((0, 0), (0, dc)))
        w1 = jnp.pad(w1, ((0, dc), (0, dc)))
        b1 = jnp.pad(b1, ((0, 0), (0, dc)))
        w2 = jnp.pad(w2, ((0, dc), (0, 0)))
    if Cout_p != Cout:
        do = Cout_p - Cout
        w2 = jnp.pad(w2, ((0, 0), (0, do)))
        b2 = jnp.pad(b2, ((0, 0), (0, do)))

    # --- Batch grid: big row tiles, multiple of the f32 sublane (8). ---
    TM = min(tm_max, _round_up(B, 8))
    B_p = _round_up(B, TM)
    if B_p != B:
        x = jnp.pad(x, ((0, B_p - B), (0, 0)))
    grid = (B_p // TM,)

    # --- bf16 MXU inputs, f32 accumulators / epilogue. ---
    x_bf = x.astype(jnp.bfloat16)
    w1_bf = w1.astype(jnp.bfloat16)
    w2_bf = w2.astype(jnp.bfloat16)
    b1_f = b1.astype(jnp.float32)
    b2_f = b2.astype(jnp.float32)

    # VMEM budget: double-buffered x/out tiles + resident bf16 weights + headroom,
    # capped below v7x's 64 MiB physical VMEM.
    tile_bytes = TM * Cin_p * 2 + TM * Cout_p * 4
    weight_bytes = (Cin_p * Cin_p + Cin_p * Cout_p) * 2 + (Cin_p + Cout_p) * 4
    vmem_limit = int(min(48 * 1024 * 1024,
                         max(16 * 1024 * 1024,
                             4 * tile_bytes + 2 * weight_bytes + (2 << 20))))

    out = pl.pallas_call(
        _projection_head_kernel,
        out_shape=jax.ShapeDtypeStruct((B_p, Cout_p), out_dtype),
        grid_spec=pltpu.PrefetchScalarGridSpec(
            num_scalar_prefetch=0,
            grid=grid,
            in_specs=[
                pl.BlockSpec((TM, Cin_p), lambda i: (i, 0)),       # x: streamed per tile
                pl.BlockSpec((Cin_p, Cin_p), lambda i: (0, 0)),    # w1: VMEM-resident
                pl.BlockSpec((1, Cin_p), lambda i: (0, 0)),        # b1: VMEM-resident
                pl.BlockSpec((Cin_p, Cout_p), lambda i: (0, 0)),   # w2: VMEM-resident
                pl.BlockSpec((1, Cout_p), lambda i: (0, 0)),       # b2: VMEM-resident
            ],
            out_specs=pl.BlockSpec((TM, Cout_p), lambda i: (i, 0)),
        ),
        compiler_params=pltpu.CompilerParams(
            dimension_semantics=("parallel",),   # megacore / v7x 2-TC batch split
            vmem_limit_bytes=vmem_limit,
        ),
    )(x_bf, w1_bf, b1_f, w2_bf, b2_f)
    return out[:B, :Cout]


def projection_head_ref(x, w1, b1, w2, b2):
    """Pure f32 reference (PyTorch semantics)."""
    h = jnp.maximum(x @ w1 + b1.reshape(1, -1), 0.0)
    y = h @ w2 + b2.reshape(1, -1)
    n = jnp.maximum(jnp.sqrt(jnp.sum(y * y, axis=-1, keepdims=True)), 1e-12)
    return y / n


def projection_head_ref_bf16(x, w1, b1, w2, b2):
    """Mirrors the kernel's mixed precision exactly: x, w1, w2 and the ReLU
    activation h are quantized to bf16 before the matmuls; accumulation, bias,
    ReLU and the normalize epilogue are f32."""
    q = lambda a: a.astype(jnp.bfloat16).astype(jnp.float32)
    h = jnp.maximum(q(x) @ q(w1) + b1.reshape(1, -1), 0.0)
    y = q(h) @ q(w2) + b2.reshape(1, -1)
    n = jnp.maximum(jnp.sqrt(jnp.sum(y * y, axis=-1, keepdims=True)), 1e-12)
    return y / n


if __name__ == "__main__":
    in_channel, out_channel, batch = 32, 16, 8

    key = jax.random.PRNGKey(0)
    kx, k1, kb1, k2, kb2 = jax.random.split(key, 5)

    # Deterministic synthetic parameters (shapes from nn.Linear(in,in), nn.Linear(in,out)).
    x = jax.random.normal(kx, (batch, in_channel), dtype=jnp.float32)
    w1 = jax.random.normal(k1, (in_channel, in_channel), dtype=jnp.float32) * 0.1
    b1 = jax.random.normal(kb1, (1, in_channel), dtype=jnp.float32) * 0.1
    w2 = jax.random.normal(k2, (in_channel, out_channel), dtype=jnp.float32) * 0.1
    b2 = jax.random.normal(kb2, (1, out_channel), dtype=jnp.float32) * 0.1

    out = projection_head(x, w1, b1, w2, b2)
    jax.block_until_ready(out)
    assert out.shape == (batch, out_channel)

    # f32 reference; kernel uses bf16 MXU inputs with f32 accumulate -> loose tolerance.
    ref = projection_head_ref(x, w1, b1, w2, b2)
    assert jnp.allclose(out, ref, atol=3e-2, rtol=3e-2), "mismatch vs f32 reference"

    # Reference that mirrors the kernel's quantization points -> tight tolerance.
    ref_bf = projection_head_ref_bf16(x, w1, b1, w2, b2)
    assert jnp.allclose(out, ref_bf, atol=2e-3, rtol=2e-3), "mismatch vs bf16-faithful reference"

    # Rows must be unit-norm.
    assert jnp.allclose(jnp.linalg.norm(out, axis=-1), 1.0, atol=1e-3)

    print("KERNEL_OK")
</pallas_src>

<mosaic_0001>
module attributes {stable_mosaic.version = 11 : i64} {
  func.func @_projection_head_kernel(%arg0: i32, %arg1: memref<8x128xbf16, #tpu.memory_space<vmem>>, %arg2: memref<128x128xbf16, #tpu.memory_space<vmem>>, %arg3: memref<1x128xf32, #tpu.memory_space<vmem>>, %arg4: memref<128x128xbf16, #tpu.memory_space<vmem>>, %arg5: memref<1x128xf32, #tpu.memory_space<vmem>>, %arg6: memref<8x128xf32, #tpu.memory_space<vmem>>) attributes {dimension_semantics = [#tpu.dimension_semantics<parallel>], iteration_bounds = array<i64: 1>, scalar_prefetch = 0 : i64, scratch_operands = 0 : i64, tpu.core_type = #tpu.core_type<tc>, window_params = [{transform_indices = @transform_0, window_bounds = array<i64: 8, 128>}, {pipeline_mode = #tpu.pipeline_mode<synchronous>, transform_indices = @transform_1, window_bounds = array<i64: 128, 128>}, {pipeline_mode = #tpu.pipeline_mode<synchronous>, transform_indices = @transform_2, window_bounds = array<i64: 1, 128>}, {pipeline_mode = #tpu.pipeline_mode<synchronous>, transform_indices = @transform_3, window_bounds = array<i64: 128, 128>}, {pipeline_mode = #tpu.pipeline_mode<synchronous>, transform_indices = @transform_4, window_bounds = array<i64: 1, 128>}, {transform_indices = @transform_5, window_bounds = array<i64: 8, 128>}]} {
    %c0 = arith.constant 0 : index
    %c0_0 = arith.constant 0 : index
    %0 = vector.load %arg1[%c0, %c0_0] : memref<8x128xbf16, #tpu.memory_space<vmem>>, vector<8x128xbf16>
    %c0_1 = arith.constant 0 : index
    %c0_2 = arith.constant 0 : index
    %1 = vector.load %arg2[%c0_1, %c0_2] : memref<128x128xbf16, #tpu.memory_space<vmem>>, vector<128x128xbf16>
    %cst = arith.constant dense<0.000000e+00> : vector<8x128xf32>
    %2 = tpu.matmul %0, %1, %cst {dimension_numbers = #tpu.dot_dimension_numbers<[1], [0], [0], [1], [0, 0, 1, 1], [], []>} : vector<8x128xbf16>, vector<128x128xbf16>, vector<8x128xf32> -> vector<8x128xf32>
    %c0_3 = arith.constant 0 : index
    %c0_4 = arith.constant 0 : index
    %3 = vector.load %arg3[%c0_3, %c0_4] : memref<1x128xf32, #tpu.memory_space<vmem>>, vector<1x128xf32>
    %4 = vector.broadcast %3 : vector<1x128xf32> to vector<8x128xf32>
    %5 = arith.addf %2, %4 : vector<8x128xf32>
    %cst_5 = arith.constant 0.000000e+00 : f32
    %6 = vector.broadcast %cst_5 : f32 to vector<8x128xf32>
    %7 = arith.maximumf %5, %6 : vector<8x128xf32>
    %8 = arith.truncf %7 : vector<8x128xf32> to vector<8x128xbf16>
    %c0_6 = arith.constant 0 : index
    %c0_7 = arith.constant 0 : index
    %9 = vector.load %arg4[%c0_6, %c0_7] : memref<128x128xbf16, #tpu.memory_space<vmem>>, vector<128x128xbf16>
    %cst_8 = arith.constant dense<0.000000e+00> : vector<8x128xf32>
    %10 = tpu.matmul %8, %9, %cst_8 {dimension_numbers = #tpu.dot_dimension_numbers<[1], [0], [0], [1], [0, 0, 1, 1], [], []>} : vector<8x128xbf16>, vector<128x128xbf16>, vector<8x128xf32> -> vector<8x128xf32>
    %c0_9 = arith.constant 0 : index
    %c0_10 = arith.constant 0 : index
    %11 = vector.load %arg5[%c0_9, %c0_10] : memref<1x128xf32, #tpu.memory_space<vmem>>, vector<1x128xf32>
    %12 = vector.broadcast %11 : vector<1x128xf32> to vector<8x128xf32>
    %13 = arith.addf %10, %12 : vector<8x128xf32>
    %14 = arith.mulf %13, %13 : vector<8x128xf32>
    %cst_11 = arith.constant dense<0.000000e+00> : vector<8xf32>
    %15 = vector.multi_reduction <add>, %14, %cst_11 [1] : vector<8x128xf32> to vector<8xf32>
    %16 = vector.shape_cast %15 : vector<8xf32> to vector<8x1xf32>
    %cst_12 = arith.constant 1.000000e-24 : f32
    %17 = vector.broadcast %cst_12 : f32 to vector<8x1xf32>
    %18 = arith.maximumf %16, %17 : vector<8x1xf32>
    %19 = math.rsqrt %18 : vector<8x1xf32>
    %20 = vector.broadcast %19 : vector<8x1xf32> to vector<8x128xf32>
    %21 = arith.mulf %13, %20 : vector<8x128xf32>
    %c0_13 = arith.constant 0 : index
    %c0_14 = arith.constant 0 : index
    %22 = vector.load %arg6[%c0_13, %c0_14] : memref<8x128xf32, #tpu.memory_space<vmem>>, vector<8x128xf32>
    tpu.vector_store %arg6[%c0_13, %c0_14], %21 {strides = array<i32>} : memref<8x128xf32, #tpu.memory_space<vmem>>, vector<8x128xf32>,
    return
  }
  func.func @transform_0(%arg0: i32) -> (i32, i32) {
    %c0_i32 = arith.constant 0 : i32
    %c0_i32_0 = arith.constant 0 : i32
    return %arg0, %c0_i32 : i32, i32
  }
  func.func @transform_1(%arg0: i32) -> (i32, i32) {
    %c0_i32 = arith.constant 0 : i32
    %c0_i32_0 = arith.constant 0 : i32
    %c0_i32_1 = arith.constant 0 : i32
    return %c0_i32, %c0_i32_0 : i32, i32
  }
  func.func @transform_2(%arg0: i32) -> (i32, i32) {
    %c0_i32 = arith.constant 0 : i32
    %c0_i32_0 = arith.constant 0 : i32
    %c0_i32_1 = arith.constant 0 : i32
    return %c0_i32, %c0_i32_0 : i32, i32
  }
  func.func @transform_3(%arg0: i32) -> (i32, i32) {
    %c0_i32 = arith.constant 0 : i32
    %c0_i32_0 = arith.constant 0 : i32
    %c0_i32_1 = arith.constant 0 : i32
    return %c0_i32, %c0_i32_0 : i32, i32
  }
  func.func @transform_4(%arg0: i32) -> (i32, i32) {
    %c0_i32 = arith.constant 0 : i32
    %c0_i32_0 = arith.constant 0 : i32
    %c0_i32_1 = arith.constant 0 : i32
    return %c0_i32, %c0_i32_0 : i32, i32
  }
  func.func @transform_5(%arg0: i32) -> (i32, i32) {
    %c0_i32 = arith.constant 0 : i32
    %c0_i32_0 = arith.constant 0 : i32
    return %arg0, %c0_i32 : i32, i32
  }
}

</mosaic_0001>

<bundles_post_ra>
// kernel: tpu_custom_call.1
= control target key start
LH: loop header
LB: loop body
LE: loop exit
PB: predicated region body
PF: predicated region fallthrough
CT: control target
= control target key end

     0   :  { %10 = vsyncpa [#allocation3], 0  ;;  %s511_s0 = inlined_call_operand.hbm [shape: bf16[8,128], index: 0, kind: input, shape index: {}]   ;;  %s512_s1 = inlined_call_operand.hbm [shape: bf16[128,128], index: 1, kind: input, shape index: {}]   ;;  %s513_s2 = inlined_call_operand.vmem [shape: f32[1,128], index: 2, kind: input, shape index: {}]   ;;  %s514_s3 = inlined_call_operand.hbm [shape: bf16[128,128], index: 3, kind: input, shape index: {}]   ;;  %s515_s4 = inlined_call_operand.vmem [shape: f32[1,128], index: 4, kind: input, shape index: {}]   ;;  %s516_s5 = inlined_call_operand.hbm [shape: f32[8,128], index: 5, kind: output, shape index: {}]  }
   0x1   :  { %11 = vsyncpa [#allocation6], 0  ;;  %s28_s20 = sshll.u32 %s512_s1, 4  ;;  %s29_s20 = int_to_ptr.hbm [resolvable:$true] %s28_s20 }
   0x2   :  { %12 = vsyncpa [#allocation4], 0  ;;  %s457_s21 = smov [#allocation5]   ;;  %s18_s25 = sshll.u32 %s511_s0, 4  ;;  %s19_s25 = int_to_ptr.hbm [resolvable:$true] %s18_s25 }
   0x3   :  { %s30_s22 = sshll.u32 %s457_s21, 4  ;;  %s458_s26 = smov 64   ;;  %s31_s22 = int_to_ptr.vmem [resolvable:$true] %s30_s22 }
   0x4   :  { %s459_s27 = smov 4   ;;  %s460_s28 = smov [#allocation2]  }
   0x5   :  { %36 = dma.hbm_to_vmem [thread:$0]  %s29_s20, 1024, %s31_s22, [#allocation6], %s458_s26, %s458_s26, %s459_s27  }
   0x6   :  { %s20_s29 = sshll.u32 %s460_s28, 4  ;;  %s43_s7 = sshll.u32 %s514_s3, 4  ;;  %s21_s29 = int_to_ptr.vmem [resolvable:$true] %s20_s29  ;;  %s44_s7 = int_to_ptr.hbm [resolvable:$true] %s43_s7 }
   0x7   :  { %23 = dma.hbm_to_vmem [thread:$0]  %s19_s25, 64, %s21_s29, [#allocation3]  }
   0x8   :  { %s461_s1 = smov [#allocation7]  }
   0x9   :  { %s45_s8 = sshll.u32 %s461_s1, 4  ;;  %s46_s8 = int_to_ptr.vmem [resolvable:$true] %s45_s8 }
   0xa   :  { %51 = dma.hbm_to_vmem [thread:$0]  %s44_s7, 1024, %s46_s8, [#allocation6], %s458_s26, %s458_s26, %s459_s27  }
   0xb   :  { %451 = dma.done.wait [#allocation3], 64  }
   0xc   :  { %452 = vsyncadd [#allocation3], 4294967232 }
   0xd   :  { %453 = dma.done.wait [#allocation6], 2048  }
   0xe   :  { %454 = vsyncadd [#allocation6], 4294965248  ;;  %v336_v0 = vld [vmem:[#allocation5 + $0x38] sm:$0xff]  ;;  %v335_v1 = vld [vmem:[#allocation5 + $0x30] sm:$0xff]  ;;  %s254_s13 = sshll.u32 %s516_s5, 4  ;;  %s255_s13 = int_to_ptr.hbm [resolvable:$true] %s254_s13 }
   0xf   :  { %135 = vmatpush.bf16.msra.mxu0 %v336_v0  ;;  %v344_v2 = vld [vmem:[#allocation7 + $0x38] sm:$0xff]  ;;  %v343_v3 = vld [vmem:[#allocation7 + $0x30] sm:$0xff]  ;;  %v334_v4 = vld [vmem:[#allocation5 + $0x28] sm:$0xff] }
  0x10   :  { %218 = vmatpush.bf16.msra.mxu1 %v344_v2  ;;  %v342_v5 = vld [vmem:[#allocation7 + $0x28] sm:$0xff]  ;;  %v333_v6 = vld [vmem:[#allocation5 + $0x20] sm:$0xff]  ;;  %v332_v8 = vld [vmem:[#allocation5 + $0x18] sm:$0xff] }
  0x11   :  { %v341_v7 = vld [vmem:[#allocation7 + $0x20] sm:$0xff]  ;;  %v340_v9 = vld [vmem:[#allocation7 + $0x18] sm:$0xff]  ;;  %v331_v10 = vld [vmem:[#allocation5 + $0x10] sm:$0xff] }
  0x12   :  { %v339_v11 = vld [vmem:[#allocation7 + $0x10] sm:$0xff]  ;;  %v330_v12 = vld [vmem:[#allocation5 + $0x8] sm:$0xff]  ;;  %v329_v13 = vld [vmem:[#allocation5] sm:$0xff] }
  0x13   :  { %136 = vmatpush.bf16.msra.mxu0 %v335_v1  ;;  %v66_v14 = vld [vmem:[#allocation2] sm:$0xf]  ;;  %v338_v15 = vld [vmem:[#allocation7 + $0x8] sm:$0xff]  ;;  %v337_v16 = vld [vmem:[#allocation7] sm:$0xff] }
  0x14   :  { %219 = vmatpush.bf16.msra.mxu1 %v343_v3  ;;  %v351_v17 = vld [vmem:[%s513_s2] ss:$0 sm:$0xff]  ;;  %s462_s2 = smov [#allocation8]  }
  0x15   :  { %v352_v23 = vld [vmem:[%s515_s4] ss:$0 sm:$0xff]  ;;  %s252_s11 = sshll.u32 %s462_s2, 4  ;;  %s253_s11 = int_to_ptr.vmem [resolvable:$true] %s252_s11 }
  0x17   :  { %137 = vmatpush.bf16.msra.mxu0 %v334_v4 }
  0x18   :  { %220 = vmatpush.bf16.msra.mxu1 %v342_v5 }
  0x1b   :  { %138 = vmatpush.bf16.msra.mxu0 %v333_v6 }
  0x1c   :  { %221 = vmatpush.bf16.msra.mxu1 %v341_v7 }
  0x1f   :  { %139 = vmatpush.bf16.msra.mxu0 %v332_v8 }
  0x20   :  { %222 = vmatpush.bf16.msra.mxu1 %v340_v9 }
  0x23   :  { %140 = vmatpush.bf16.msra.mxu0 %v331_v10 }
  0x24   :  { %223 = vmatpush.bf16.msra.mxu1 %v339_v11 }
  0x27   :  { %141 = vmatpush.bf16.msra.mxu0 %v330_v12 }
  0x28   :  { %224 = vmatpush.bf16.msra.mxu1 %v338_v15 }
  0x2b   :  { %142 = vmatpush.bf16.msra.mxu0 %v329_v13 }
  0x2c   :  { %225 = vmatpush.bf16.msra.mxu1 %v337_v16 }
  0x2e   :  { %143 = vmatmul.bf16.vlgmr.msra.gmra.mxu0 %v66_v14 }
  0xab   :  { %v144_v18 = vpop.f32.mrf.mxu0 }
  0xac   :  { %v145_v19 = vadd.f32 %v351_v17, %v144_v18 }
  0xae   :  { %v148_v20 = vmax.f32 %v145_v19, 0.0 }
  0xb0   :  { %v149_v21 = vpack.c.bf16 %v148_v20, %v148_v20 }
  0xb2   :  { %226 = vmatmul.bf16.vlgmr.msra.gmra.mxu1 %v149_v21 }
  0xb3   :  { %v146_v22 = vpop.f32.mrf.mxu0 }
 0x12f   :  { %v227_v24 = vpop.f32.mrf.mxu1 }
 0x130   :  { %v228_v25 = vadd.f32 %v352_v23, %v227_v24 }
 0x132   :  { %v231_v26 = vmul.f32 %v228_v25, %v228_v25 }
 0x134   :  { %232 = vadd.xlane.f32.xlu0 %v231_v26 }
 0x137   :  { %v229_v27 = vpop.f32.mrf.mxu1 }
 0x1a7   :  { %v233_v28 = vpop.xlane.xlu0 %232 }
 0x1a8   :  { %v234_v29 = vmax.f32 %v233_v28, 1e-24 }
 0x1aa   :  { %353 = vrsqrt.f32 %v234_v29  ;;  %vm241_vm1 = vweird.f32 %v234_v29 }
 0x1b0   :  { %v354_v30 = vpop.eup %353 }
 0x1b1   :  { %v236_v31 = vmul.f32 %v354_v30, %v234_v29  ;;  %vm242_vm0 = vweird.f32 %v354_v30 }
 0x1b2   :  { %vm243_vm2 = vmor %vm241_vm1, %vm242_vm0 }
 0x1b3   :  { %v237_v32 = vmul.f32 %v354_v30, %v236_v31 }
 0x1b5   :  { %v238_v33 = vmul.f32 0.5, %v237_v32 }
 0x1b7   :  { %v239_v34 = vsub.f32 1.5, %v238_v33 }
 0x1b9   :  { %v240_v35 = vmul.f32 %v354_v30, %v239_v34 }
 0x1bb   :  { %v244_v36 = vsel %vm243_vm2, %v354_v30, %v240_v35 }
 0x1bc   :  { %v245_v37 = vmul.f32 %v244_v36, %v228_v25 }
 0x1be   :  { %246 = vst [vmem:[#allocation8] sm:$0xff] %v245_v37 }
 0x1bf   :  { %257 = dma.vmem_to_hbm [thread:$0]  %s253_s11, 128, %s255_s13, [#allocation4]  }
 0x1c0   :  { %455 = dma.done.wait [#allocation4], 128  }
 0x1c1   :  { %456 = vsyncadd [#allocation4], 4294967168 }
 0x1c2   :  { %262 = vsyncpa [#allocation3], 1 }
 0x1c3   :  { %263 = vsyncpa [#allocation6], 1 }
 0x1c4   :  { %264 = vsyncpa [#allocation4], 1 }

</bundles_post_ra>
